<compile_context>
chip_gen: v6e
topology: v6e:2x2x1
jax: 0.10.0
libtpu: 0.0.40
codegen_flags: <defaults>
</compile_context>

<pallas_src>
import jax
import jax.numpy as jnp
import numpy as np
from jax.experimental import pallas as pl
from jax.experimental.pallas import tpu as pltpu

_INV_SQRT2 = 0.7071067811865476  # exact (erf-based) GELU, matching nn.GELU default


def _erf_gelu(x):
    return 0.5 * x * (1.0 + jax.lax.erf(x * _INV_SQRT2))


def _choose_tiling(HW, n_img, C, E, budget_bytes=8 << 20):
    """Pick (tile_hw, G): lane-dense pixel tile and image-group block size.

    Per-step single-buffer footprint ~ 4*(G*(2C+E) + E)*tile_hw bytes; Pallas
    double-buffers, so an 8 MiB budget stays <= ~16 MiB -- safe under the
    16 MiB (v5e) / 32 MiB (v6e, v7x) scoped-VMEM defaults.  On v6e (128 MiB
    physical) this budget can be raised to ~24-32 MiB for very large HW.
    """
    per_pixel_img = 4 * (2 * C + E)       # x-block + out-block bytes per pixel per image
    per_pixel_ce = 4 * E                  # ce-block bytes per pixel

    # --- pixel tile (maps to TPU lanes; multiple of 128 whenever we tile) ---
    max_tile = max(128, budget_bytes // (per_pixel_img + per_pixel_ce))
    if HW <= max_tile:
        tile_hw = HW
    else:
        cap = (max_tile // 128) * 128
        tile_hw = 0
        t = cap
        while t >= 128:                   # prefer an exact multiple-of-128 divisor
            if HW % t == 0:
                tile_hw = t
                break
            t -= 128
        if tile_hw < max(256, cap // 2):  # avoid the tiny-tile regime; accept a
            tile_hw = cap                 # partial (masked) last tile instead

    # --- image group along the B*F axis ---
    per_img = per_pixel_img * tile_hw
    g_max = max(1, (budget_bytes - per_pixel_ce * tile_hw) // per_img)
    G = min(n_img, int(g_max))
    while G > 1 and n_img % G != 0:       # prefer an exact divisor (no partial group)
        G -= 1

    # --- make sure >= 2 parallel grid units when possible (v7x megacore) ---
    nt = pl.cdiv(HW, tile_hw)
    ng = pl.cdiv(n_img, G)
    if nt * ng < 2:
        if n_img >= 2:
            G = pl.cdiv(n_img, 2)
        elif tile_hw % 256 == 0:
            tile_hw //= 2
    return tile_hw, G


def _make_fused_kernel(C):
    def kernel(x_ref, ce_ref, fe_ref, out_ref):
        # x_ref : (G, C, T)     latent block for G images at this pixel tile
        # ce_ref: (E, T)        coord-MLP output for this tile (image-independent)
        # fe_ref: (G, E, 1)     face-embedding column per image (pixel-independent)
        # out   : (G, C+E, T)   final output block
        out_ref[:, :C, :] = x_ref[...].astype(out_ref.dtype)
        out_ref[:, C:, :] = (fe_ref[...] + ce_ref[...][None, :, :]).astype(out_ref.dtype)
    return kernel


def _fused_pe_concat(x_flat, ce, fe, *, C, E, HW):
    n_img = x_flat.shape[0]
    tile_hw, G = _choose_tiling(HW, n_img, C, E)
    grid = (pl.cdiv(HW, tile_hw), pl.cdiv(n_img, G))  # (pixel tiles, image groups)

    return pl.pallas_call(
        _make_fused_kernel(C),
        out_shape=jax.ShapeDtypeStruct((n_img, C + E, HW), jnp.float32),
        grid=grid,
        in_specs=[
            pl.BlockSpec((G, C, tile_hw), lambda t, g: (g, 0, t)),   # latents
            pl.BlockSpec((E, tile_hw), lambda t, g: (0, t)),         # coord-MLP (re-DMA only when t changes)
            pl.BlockSpec((G, E, 1), lambda t, g: (g, 0, 0)),         # face embeddings (tiny)
        ],
        out_specs=pl.BlockSpec((G, C + E, tile_hw), lambda t, g: (g, 0, t)),
        compiler_params=pltpu.CompilerParams(
            dimension_semantics=("parallel", "parallel"),
            vmem_limit_bytes=32 << 20),
    )(x_flat, ce, fe)


def init_params(key, num_faces=6, embedding_dim=10):
    """Deterministic synthetic parameters matching the nn.Module's shapes."""
    E = embedding_dim
    k1, k2, k3, k4, k5 = jax.random.split(key, 5)
    face_emb = jax.random.normal(k1, (num_faces, E), jnp.float32)   # nn.Embedding ~ N(0,1)
    lim1 = 1.0 / np.sqrt(2.0)
    w1 = jax.random.uniform(k2, (E, 2), jnp.float32, -lim1, lim1)   # Linear(2, E)
    b1 = jax.random.uniform(k3, (E,), jnp.float32, -lim1, lim1)
    lim2 = 1.0 / np.sqrt(E)
    w2 = jax.random.uniform(k4, (E, E), jnp.float32, -lim2, lim2)   # Linear(E, E)
    b2 = jax.random.uniform(k5, (E,), jnp.float32, -lim2, lim2)
    return dict(face_emb=face_emb, w1=w1, b1=b1, w2=w2, b2=b2)


def cubemap_positional_encoding(latents, params, num_faces=6):
    """latents: [B, F, C, H, W] or [B*F, C, H, W] -> [B*F, C+E, H, W] (NCHW)."""
    if latents.ndim == 5:
        B, F, C, H, W = latents.shape
        x = latents.reshape(B * F, C, H, W)
    else:
        F = num_faces
        B = latents.shape[0] // F
        C, H, W = latents.shape[1], latents.shape[2], latents.shape[3]
        x = latents
    E = params["face_emb"].shape[1]
    HW = H * W
    n_img = B * F

    # Face-independent coord MLP, hoisted out of the kernel (review opt #1).
    # O(E*HW) elements: negligible vs the (B*F, C+E, HW) output it feeds.
    xs = jnp.linspace(-1.0, 1.0, W, dtype=jnp.float32)
    ys = jnp.linspace(-1.0, 1.0, H, dtype=jnp.float32)
    cx = jnp.broadcast_to(xs[None, :], (H, W)).reshape(HW)
    cy = jnp.broadcast_to(ys[:, None], (H, W)).reshape(HW)
    coords = jnp.stack([cx, cy], axis=0)                            # (2, HW), HW on lanes
    h1 = params["w1"] @ coords + params["b1"][:, None]              # (E, HW)
    h1 = _erf_gelu(h1)
    ce = params["w2"] @ h1 + params["b2"][:, None]                  # (E, HW)

    # Face embeddings pre-expanded once to (B*F, E, 1) -- tiny (review opt #2).
    fe = jnp.broadcast_to(params["face_emb"][None, :, :, None],
                          (B, F, E, 1)).reshape(n_img, E, 1)

    x_flat = x.reshape(n_img, C, HW)            # free reshape (contiguous merge)
    out = _fused_pe_concat(x_flat, ce, fe, C=C, E=E, HW=HW)
    return out.reshape(n_img, C + E, H, W)


def _reference(latents, params, num_faces=6):
    """Pure-JAX reference mirroring the PyTorch forward, for a sanity check."""
    if latents.ndim == 5:
        B, F, C, H, W = latents.shape
        x = latents.reshape(B * F, C, H, W)
    else:
        F = num_faces
        B = latents.shape[0] // F
        C, H, W = latents.shape[1:]
        x = latents
    E = params["face_emb"].shape[1]
    ys = jnp.linspace(-1.0, 1.0, H, dtype=jnp.float32)
    xs = jnp.linspace(-1.0, 1.0, W, dtype=jnp.float32)
    xs_g = jnp.broadcast_to(xs[None, :], (H, W))
    ys_g = jnp.broadcast_to(ys[:, None], (H, W))
    coords = jnp.stack([xs_g, ys_g], axis=-1).reshape(-1, 2)           # (HW, 2)
    h = coords @ params["w1"].T + params["b1"]
    h = _erf_gelu(h)
    ce = h @ params["w2"].T + params["b2"]                             # (HW, E)
    pe = params["face_emb"][:, None, :] + ce[None, :, :]               # (F, HW, E)
    pe = pe.reshape(F, H, W, E).transpose(0, 3, 1, 2)                  # (F, E, H, W)
    pe = jnp.broadcast_to(pe[None], (B, F, E, H, W)).reshape(B * F, E, H, W)
    return jnp.concatenate([x.astype(jnp.float32), pe], axis=1)


if __name__ == "__main__":
    key = jax.random.PRNGKey(0)
    k_param, k_data = jax.random.split(key)

    num_faces, embedding_dim = 6, 10
    B, C, H, W = 2, 4, 16, 16
    params = init_params(k_param, num_faces=num_faces, embedding_dim=embedding_dim)
    latents = jax.random.normal(k_data, (B, num_faces, C, H, W), jnp.float32)

    out = cubemap_positional_encoding(latents, params, num_faces=num_faces)
    out = jax.block_until_ready(out)

    ref = jax.block_until_ready(_reference(latents, params, num_faces=num_faces))
    assert out.shape == (B * num_faces, C + embedding_dim, H, W), out.shape
    # All-f32 path: tight tolerance so real regressions are caught.
    np.testing.assert_allclose(np.asarray(out), np.asarray(ref), rtol=1e-5, atol=1e-5)

    print("KERNEL_OK")
</pallas_src>

<mosaic_0001>
module attributes {stable_mosaic.version = 11 : i64} {
  func.func @kernel(%arg0: i32, %arg1: i32, %arg2: memref<6x4x256xf32, #tpu.memory_space<vmem>>, %arg3: memref<10x256xf32, #tpu.memory_space<vmem>>, %arg4: memref<6x10x1xf32, #tpu.memory_space<vmem>>, %arg5: memref<6x14x256xf32, #tpu.memory_space<vmem>>) attributes {dimension_semantics = [#tpu.dimension_semantics<parallel>, #tpu.dimension_semantics<parallel>], iteration_bounds = array<i64: 1, 2>, scalar_prefetch = 0 : i64, scratch_operands = 0 : i64, tpu.core_type = #tpu.core_type<tc>, window_params = [{transform_indices = @transform_0, window_bounds = array<i64: 6, 4, 256>}, {transform_indices = @transform_1, window_bounds = array<i64: 10, 256>}, {transform_indices = @transform_2, window_bounds = array<i64: 6, 10, 1>}, {transform_indices = @transform_3, window_bounds = array<i64: 6, 14, 256>}]} {
    %c0 = arith.constant 0 : index
    %c0_0 = arith.constant 0 : index
    %c0_1 = arith.constant 0 : index
    %0 = vector.load %arg2[%c0, %c0_0, %c0_1] : memref<6x4x256xf32, #tpu.memory_space<vmem>>, vector<6x4x256xf32>
    %c0_2 = arith.constant 0 : index
    %c0_3 = arith.constant 0 : index
    %c0_4 = arith.constant 0 : index
    %1 = vector.load %arg5[%c0_2, %c0_3, %c0_4] : memref<6x14x256xf32, #tpu.memory_space<vmem>>, vector<6x4x256xf32>
    tpu.vector_store %arg5[%c0_2, %c0_3, %c0_4], %0 {strides = array<i32>} : memref<6x14x256xf32, #tpu.memory_space<vmem>>, vector<6x4x256xf32>,
    %c0_5 = arith.constant 0 : index
    %c0_6 = arith.constant 0 : index
    %c0_7 = arith.constant 0 : index
    %2 = vector.load %arg4[%c0_5, %c0_6, %c0_7] : memref<6x10x1xf32, #tpu.memory_space<vmem>>, vector<6x10x1xf32>
    %c0_8 = arith.constant 0 : index
    %c0_9 = arith.constant 0 : index
    %3 = vector.load %arg3[%c0_8, %c0_9] : memref<10x256xf32, #tpu.memory_space<vmem>>, vector<10x256xf32>
    %4 = vector.shape_cast %3 : vector<10x256xf32> to vector<1x10x256xf32>
    %5 = vector.broadcast %2 : vector<6x10x1xf32> to vector<6x10x256xf32>
    %6 = vector.broadcast %4 : vector<1x10x256xf32> to vector<6x10x256xf32>
    %7 = arith.addf %5, %6 : vector<6x10x256xf32>
    %c0_10 = arith.constant 0 : index
    %c4 = arith.constant 4 : index
    %c0_11 = arith.constant 0 : index
    %8 = vector.load %arg5[%c0_10, %c4, %c0_11] : memref<6x14x256xf32, #tpu.memory_space<vmem>>, vector<6x10x256xf32>
    tpu.vector_store %arg5[%c0_10, %c4, %c0_11], %7 {strides = array<i32>} : memref<6x14x256xf32, #tpu.memory_space<vmem>>, vector<6x10x256xf32>,
    return
  }
  func.func @transform_0(%arg0: i32, %arg1: i32) -> (i32, i32, i32) {
    %c0_i32 = arith.constant 0 : i32
    %c0_i32_0 = arith.constant 0 : i32
    return %arg1, %c0_i32, %arg0 : i32, i32, i32
  }
  func.func @transform_1(%arg0: i32, %arg1: i32) -> (i32, i32) {
    %c0_i32 = arith.constant 0 : i32
    %c0_i32_0 = arith.constant 0 : i32
    return %c0_i32, %arg0 : i32, i32
  }
  func.func @transform_2(%arg0: i32, %arg1: i32) -> (i32, i32, i32) {
    %c0_i32 = arith.constant 0 : i32
    %c0_i32_0 = arith.constant 0 : i32
    %c0_i32_1 = arith.constant 0 : i32
    return %arg1, %c0_i32, %c0_i32_0 : i32, i32, i32
  }
  func.func @transform_3(%arg0: i32, %arg1: i32) -> (i32, i32, i32) {
    %c0_i32 = arith.constant 0 : i32
    %c0_i32_0 = arith.constant 0 : i32
    return %arg1, %c0_i32, %arg0 : i32, i32, i32
  }
}

</mosaic_0001>

<bundles_post_ra>
// kernel: tpu_custom_call.1
= control target key start
LH: loop header
LB: loop body
LE: loop exit
PB: predicated region body
PF: predicated region fallthrough
CT: control target
= control target key end

     0   :  { %8 = vsyncpa [#allocation3], 0  ;;  %s1038_s0 = inlined_call_operand.vmem [shape: f32[12,4,256], index: 0, kind: input, shape index: {}]   ;;  %s1039_s1 = inlined_call_operand.vmem [shape: f32[10,256], index: 1, kind: input, shape index: {}]   ;;  %s1040_s2 = inlined_call_operand.vmem [shape: f32[12,10,1], index: 2, kind: input, shape index: {}]   ;;  %s1041_s3 = inlined_call_operand.hbm [shape: f32[12,14,256], index: 3, kind: output, shape index: {}]  }
   0x1   :  { %10 = vsyncpa [#allocation3 + $0x1], 0  ;;  %s809_s12 = smov 0   ;;  %s811_s13 = smov 0  }
   0x2   :  { %s813_s14 = smov 0   ;;  %s815_s15 = smov 0  }
   0x3   :  { %s817_s16 = smov 0   ;;  %s819_s17 = smov 0  }
   0x4 LB: > { %s621_s18 = sadd.s32 4294967295, %s783_s17   ;;  %s622_s19 = sadd.s32 4294967294, %s783_s17   ;;  %s783_s17 = sphi %s819_s17, %s16_s17   ;;  %s779_s16 = sphi %s817_s16, %s1048_s16   ;;  %s775_s15 = sphi %s815_s15, %s1047_s15   ;;  %s771_s14 = sphi %s813_s14, %s1046_s14   ;;  %s767_s13 = sphi %s811_s13, %s1045_s13   ;;  %s763_s12 = sphi %s809_s12, %s1044_s12  }
   0x5   : > { %s25_s20 = sadd.s32 1, %s779_s16  ;;  %s117_s21 = sadd.s32 1, %s771_s14 }
   0x6   : > { %p26_p0 = scmp.ge.s32.totalorder %s25_s20, 2  ;;  %p127_p1 = scmp.ne.s32.totalorder %s771_s14, %s767_s13 }
   0x7   : > { %p128_p2 = scmp.eq.s32.totalorder %s621_s18, 1  ;;  %p133_p3 = scmp.ne.s32.totalorder %s767_s13, %s763_s12 }
   0x8   : > { %s1050_s20 = smov (%p26_p0, %s25_s20), 0  ;;  %p134_p5 = scmp.eq.s32.totalorder %s622_s19, 1 }
   0x9   : > { %p849_p4 = por %p128_p2, %p127_p1  ;;  %s112_s23 = ssub.s32 %s779_s16, %s1050_s20 }
   0xa   : > { %p626_p6 = scmp.ge.s32.totalorder %s783_s17, 1  ;;  %p115_p7 = scmp.eq.s32.totalorder %s112_s23, 0 }
   0xb   : > { %p856_p8 = por %p134_p5, %p133_p3  ;;  %p186_p9 = scmp.lt.s32.totalorder %s783_s17, 3 }
   0xc   : > { %s862_s25 = scalar_select %p115_p7, %s771_s14, %s117_s21  }
   0xd   : > { %p187_p10 = pnand %p626_p6, %p186_p9 }
   0xe   : > { %s226_s26 = smul.u32 (!%p187_p10), 6, %s775_s15  ;;  %s223_s27 = sand.u32 (!%p187_p10), 1, %s767_s13  }
   0xf   : > { %190 = sbr.rel (%p187_p10) target bundleno = 190 (0xbe), region = 32  ;;  %s993_s7 = scalar_lea.sflag (!%p187_p10), [#allocation3], %s223_s27 }
  0x10   : > { %p228_p11 = scmp.lt.s32.totalorder (!%p187_p10), %s226_s26, 11  ;;  %s640_s28 = smul.u32 (!%p187_p10), 192, %s223_s27 }
  0x12   : > { %s877_s10 = scalar_lea.vmem (!%p187_p10), [#allocation2], %s640_s28 }
  0x13   : > { %s515_s4 = sshll.u32 (!%p187_p10), %s877_s10, 4  ;;  %s983_s4 = int_to_ptr.vmem [resolvable:$true] %s515_s4 }
  0x14   : > { %v785_v0 = vmov 0   ;;  %s1052_s26 = smov (!%p228_p11, %s226_s26), 11  ;;  %v905_v25 = vld [vmem:[%s1039_s1] sm:$0xff]  ;;  %v910_v26 = vld [vmem:[%s1039_s1 + $0x8] sm:$0xff]  ;;  %v917_v31 = vld [vmem:[%s1039_s1 + $0x10] sm:$0x3] }
  0x15   : > { %700 = vset.pattern.permute.xlu1 %v785_v0  ;;  %699 = vset.pattern.permute.xlu0 %v785_v0  ;;  %s636_s29 = sshll.u32 %s1052_s26, 4  ;;  %s635_s30 = sshll.u32 %s1052_s26, 3  ;;  %v922_v32 = vld [vmem:[%s1039_s1 + $0x18] sm:$0x3]  ;;  %vm413_vm0 = vcmask 1043456  }
  0x16   : > { %s871_s6 = scalar_lea.vmem %s1040_s2, %s636_s29  ;;  %s235_s9 = scalar_lea.vmem %s1038_s0, %s635_s30 }
  0x17   : > { %v291_v1 = vld [vmem:[%s871_s6 + $0x10] sm:$0xff]  ;;  %v253_v2 = vld [vmem:[%s235_s9] sm:$0xff]  ;;  %v254_v3 = vld [vmem:[%s235_s9 + $0x8] sm:$0xff]  ;;  %s639_s30 = smul.u32 3072, %s775_s15  ;;  %s707_s8 = scalar_lea.vmem %s983_s4, 3072 }
  0x18   : > { %317 = vperm.xlu1 %700, %v291_v1   ;;  %v255_v4 = vld [vmem:[%s235_s9 + $0x10] sm:$0xff]  ;;  %v256_v5 = vld [vmem:[%s235_s9 + $0x18] sm:$0xff]  ;;  %v257_v6 = vld [vmem:[%s235_s9 + $0x20] sm:$0xff]  ;;  %v265_v7 = vcombine.high %v253_v2, %v253_v2  ;;  %v266_v8 = vcombine.high %v254_v3, %v254_v3  ;;  %277 = vst [vmem:[%s877_s10] sm:$0xf] %v253_v2  ;;  %p708_p12 = scmp.ne.s32.totalorder %s983_s4, %s707_s8 }
  0x19   : > { %279 = vst [vmem:[%s877_s10 + $0x20] sm:$0xf] %v254_v3  ;;  %v258_v9 = vld [vmem:[%s235_s9 + $0x28] sm:$0xff]  ;;  %v267_v10 = vcombine.high %v255_v4, %v255_v4  ;;  %v268_v11 = vcombine.high %v256_v5, %v256_v5  ;;  %v269_v12 = vcombine.high %v257_v6, %v257_v6  ;;  %281 = vst [vmem:[%s877_s10 + $0x40] sm:$0xf] %v255_v4  ;;  %v289_v13 = vld [vmem:[%s871_s6] sm:$0xff] }
  0x1a   : > { %283 = vst [vmem:[%s877_s10 + $0x60] sm:$0xf] %v256_v5  ;;  %285 = vst [vmem:[%s877_s10 + $0x80] sm:$0xf] %v257_v6  ;;  %v292_v14 = vld [vmem:[%s871_s6 + $0x18] sm:$0x3]  ;;  %v270_v15 = vcombine.high %v258_v9, %v258_v9  ;;  %307 = vperm.xlu0 %699, %v289_v13   ;;  %p709_p13 = pnand %p708_p12, %p849_p4 }
  0x1b   : > { %278 = vst [vmem:[%s877_s10 + $0x8] sm:$0xf] %v265_v7  ;;  %280 = vst [vmem:[%s877_s10 + $0x28] sm:$0xf] %v266_v8  ;;  %v290_v16 = vld [vmem:[%s871_s6 + $0x8] sm:$0x3] }
  0x1c   : > { %287 = vst [vmem:[%s877_s10 + $0xa0] sm:$0xf] %v258_v9  ;;  %282 = vst [vmem:[%s877_s10 + $0x48] sm:$0xf] %v267_v10  ;;  %322 = vperm.xlu1 %700, %v292_v14   ;;  %v294_v17 = vld [vmem:[%s871_s6 + $0x28] sm:$0x3]  ;;  %p710_p0 = pneg %p709_p13 }
  0x1d   : > { %284 = vst [vmem:[%s877_s10 + $0x68] sm:$0xf] %v268_v11  ;;  %286 = vst [vmem:[%s877_s10 + $0x88] sm:$0xf] %v269_v12  ;;  %v293_v18 = vld [vmem:[%s871_s6 + $0x20] sm:$0xff]  ;;  %v295_v20 = vld [vmem:[%s871_s6 + $0x30] sm:$0xff] }
  0x1e   : > { %288 = vst [vmem:[%s877_s10 + $0xa8] sm:$0xf] %v270_v15  ;;  %312 = vperm.xlu0 %699, %v290_v16   ;;  %v296_v19 = vld [vmem:[%s871_s6 + $0x38] sm:$0x3]  ;;  %v298_v21 = vld [vmem:[%s871_s6 + $0x48] sm:$0x3] }
  0x1f   : > { %v297_v22 = vld [vmem:[%s871_s6 + $0x40] sm:$0xff]  ;;  %v300_v23 = vld [vmem:[%s871_s6 + $0x58] sm:$0x3]  ;;  %v299_v24 = vld [vmem:[%s871_s6 + $0x50] sm:$0xff]  ;;  %s981_s6 = scalar_lea.hbm %s1041_s3, %s639_s30  ;;  %s786_s9 = smov [#allocation2]  }
  0x20   : > { %332 = vperm.xlu1 %700, %v294_v17   ;;  %s711_s11 = sshll.u32 %s786_s9, 4  ;;  %s712_s11 = int_to_ptr.vmem [resolvable:$false] %s711_s11 }
  0x21   : > { %s713_s18 = scalar_lea.vmem %s712_s11, 6144  ;;  %p714_p1 = scmp.lt.s32.totalorder %s983_s4, %s712_s11 }
  0x22   : > { %327 = vperm.xlu0 %699, %v293_v18   ;;  %p715_p2 = scmp.lt.s32.totalorder %s713_s18, %s707_s8 }
  0x24   : > { %342 = vperm.xlu1 %700, %v296_v19   ;;  %p716_p3 = por %p715_p2, %p714_p1 }
  0x26   : > { %337 = vperm.xlu0 %699, %v295_v20   ;;  %p717_p5 = pnand %p716_p3, %p710_p0 }
  0x28   : > { %352 = vperm.xlu1 %700, %v298_v21  }
  0x2a   : > { %347 = vperm.xlu0 %699, %v297_v22  }
  0x2c   : > { %362 = vperm.xlu1 %700, %v300_v23  }
  0x2e   : > { %357 = vperm.xlu0 %699, %v299_v24  }
  0x93   : > { %v318_v27 = vpop.permute.xlu1 %317 }
  0x94   : > { %v369_v28 = vadd.f32 %v318_v27, %v905_v25  ;;  %v370_v29 = vadd.f32 %v318_v27, %v910_v26 }
  0x95   : > { %v308_v30 = vpop.permute.xlu0 %307 }
  0x96   : > { %v420_v33 = vrot.slane %v369_v28, 4  ;;  %v421_v34 = vrot.slane %v370_v29, 4  ;;  %v365_v35 = vadd.f32 %v308_v30, %v905_v25  ;;  %v366_v36 = vadd.f32 %v308_v30, %v910_v26 }
  0x97   : > { %v323_v37 = vpop.permute.xlu1 %322 }
  0x98   : > { %478 = vst [vmem:[%s877_s10 + $0x20] sm:$0xf0] %v420_v33  ;;  %479 = vst [vmem:[%s877_s10 + $0x28] sm:$0xf0] %v421_v34  ;;  %v414_v38 = vrot.slane %v365_v35, 4  ;;  %v415_v39 = vrot.slane %v366_v36, 4  ;;  %v371_v40 = vadd.f32 %v323_v37, %v917_v31  ;;  %v372_v41 = vadd.f32 %v323_v37, %v922_v32 }
  0x99   : > { %v313_v42 = vpop.permute.xlu0 %312 }
  0x9a   : > { %474 = vst [vmem:[%s877_s10] sm:$0xf0] %v414_v38  ;;  %475 = vst [vmem:[%s877_s10 + $0x8] sm:$0xf0] %v415_v39  ;;  %v422_v43 = vrot.slane %v371_v40, 4  ;;  %v424_v44 = vrot.slane %v372_v41, 4  ;;  %v367_v45 = vadd.f32 %v313_v42, %v917_v31  ;;  %v368_v46 = vadd.f32 %v313_v42, %v922_v32 }
  0x9b   : > { %v333_v47 = vpop.permute.xlu1 %332 }
  0x9c   : > { %v423_v48 = vsel %vm413_vm0, %v420_v33, %v422_v43  ;;  %v425_v49 = vsel %vm413_vm0, %v421_v34, %v424_v44  ;;  %v416_v50 = vrot.slane %v367_v45, 4  ;;  %v418_v51 = vrot.slane %v368_v46, 4 }
  0x9d   : > { %480 = vst [vmem:[%s877_s10 + $0x30] sm:$0x3f] %v423_v48  ;;  %481 = vst [vmem:[%s877_s10 + $0x38] sm:$0x3f] %v425_v49  ;;  %v375_v52 = vadd.f32 %v333_v47, %v917_v31  ;;  %v376_v53 = vadd.f32 %v333_v47, %v922_v32  ;;  %v328_v54 = vpop.permute.xlu0 %327 }
  0x9e   : > { %v417_v55 = vsel %vm413_vm0, %v414_v38, %v416_v50  ;;  %v419_v56 = vsel %vm413_vm0, %v415_v39, %v418_v51  ;;  %v373_v57 = vadd.f32 %v328_v54, %v905_v25  ;;  %v374_v58 = vadd.f32 %v328_v54, %v910_v26 }
  0x9f   : > { %476 = vst [vmem:[%s877_s10 + $0x10] sm:$0x3f] %v417_v55  ;;  %477 = vst [vmem:[%s877_s10 + $0x18] sm:$0x3f] %v419_v56  ;;  %v428_v59 = vrot.slane %v375_v52, 4  ;;  %v430_v60 = vrot.slane %v376_v53, 4  ;;  %v343_v61 = vpop.permute.xlu1 %342 }
  0xa0   : > { %v426_v62 = vrot.slane %v373_v57, 4  ;;  %v427_v63 = vrot.slane %v374_v58, 4  ;;  %v379_v0 = vadd.f32 %v343_v61, %v917_v31  ;;  %v380_v1 = vadd.f32 %v343_v61, %v922_v32 }
  0xa1   : > { %v338_v2 = vpop.permute.xlu0 %337 }
  0xa2   : > { %v429_v3 = vsel %vm413_vm0, %v426_v62, %v428_v59  ;;  %v431_v4 = vsel %vm413_vm0, %v427_v63, %v430_v60  ;;  %482 = vst [vmem:[%s877_s10 + $0x40] sm:$0xf0] %v426_v62  ;;  %483 = vst [vmem:[%s877_s10 + $0x48] sm:$0xf0] %v427_v63  ;;  %v434_v5 = vrot.slane %v379_v0, 4  ;;  %v436_v6 = vrot.slane %v380_v1, 4 }
  0xa3   : > { %484 = vst [vmem:[%s877_s10 + $0x50] sm:$0x3f] %v429_v3  ;;  %485 = vst [vmem:[%s877_s10 + $0x58] sm:$0x3f] %v431_v4  ;;  %v377_v7 = vadd.f32 %v338_v2, %v905_v25  ;;  %v378_v8 = vadd.f32 %v338_v2, %v910_v26  ;;  %v353_v9 = vpop.permute.xlu1 %352 }
  0xa4   : > { %v383_v10 = vadd.f32 %v353_v9, %v917_v31  ;;  %v384_v11 = vadd.f32 %v353_v9, %v922_v32 }
  0xa5   : > { %v432_v12 = vrot.slane %v377_v7, 4  ;;  %v433_v13 = vrot.slane %v378_v8, 4  ;;  %v348_v14 = vpop.permute.xlu0 %347 }
  0xa6   : > { %v440_v15 = vrot.slane %v383_v10, 4  ;;  %v442_v16 = vrot.slane %v384_v11, 4  ;;  %v381_v17 = vadd.f32 %v348_v14, %v905_v25  ;;  %v382_v18 = vadd.f32 %v348_v14, %v910_v26 }
  0xa7   : > { %v435_v19 = vsel %vm413_vm0, %v432_v12, %v434_v5  ;;  %v437_v20 = vsel %vm413_vm0, %v433_v13, %v436_v6  ;;  %486 = vst [vmem:[%s877_s10 + $0x60] sm:$0xf0] %v432_v12  ;;  %487 = vst [vmem:[%s877_s10 + $0x68] sm:$0xf0] %v433_v13  ;;  %v363_v21 = vpop.permute.xlu1 %362 }
  0xa8   : > { %488 = vst [vmem:[%s877_s10 + $0x70] sm:$0x3f] %v435_v19  ;;  %489 = vst [vmem:[%s877_s10 + $0x78] sm:$0x3f] %v437_v20  ;;  %v438_v22 = vrot.slane %v381_v17, 4  ;;  %v439_v23 = vrot.slane %v382_v18, 4  ;;  %v387_v24 = vadd.f32 %v363_v21, %v917_v31  ;;  %v388_v27 = vadd.f32 %v363_v21, %v922_v32 }
  0xa9   : > { %v358_v28 = vpop.permute.xlu0 %357 }
  0xaa   : > { %v441_v29 = vsel %vm413_vm0, %v438_v22, %v440_v15  ;;  %v443_v30 = vsel %vm413_vm0, %v439_v23, %v442_v16  ;;  %490 = vst [vmem:[%s877_s10 + $0x80] sm:$0xf0] %v438_v22  ;;  %491 = vst [vmem:[%s877_s10 + $0x88] sm:$0xf0] %v439_v23  ;;  %v446_v33 = vrot.slane %v387_v24, 4  ;;  %v448_v31 = vrot.slane %v388_v27, 4 }
  0xab   : > { %492 = vst [vmem:[%s877_s10 + $0x90] sm:$0x3f] %v441_v29  ;;  %493 = vst [vmem:[%s877_s10 + $0x98] sm:$0x3f] %v443_v30  ;;  %v385_v32 = vadd.f32 %v358_v28, %v905_v25  ;;  %v386_v34 = vadd.f32 %v358_v28, %v910_v26 }
  0xad   : > { %v444_v35 = vrot.slane %v385_v32, 4  ;;  %v445_v36 = vrot.slane %v386_v34, 4 }
  0xaf   : > { %v447_v37 = vsel %vm413_vm0, %v444_v35, %v446_v33  ;;  %v449_v38 = vsel %vm413_vm0, %v445_v36, %v448_v31  ;;  %494 = vst [vmem:[%s877_s10 + $0xa0] sm:$0xf0] %v444_v35  ;;  %495 = vst [vmem:[%s877_s10 + $0xa8] sm:$0xf0] %v445_v36 }
  0xb0   : > { %496 = vst [vmem:[%s877_s10 + $0xb0] sm:$0x3f] %v447_v37  ;;  %497 = vst [vmem:[%s877_s10 + $0xb8] sm:$0x3f] %v449_v38 }
  0xb1   : > { %720 = shalt.err (!%p717_p5)
}
  0xb2   : > { %s721_s27 = scalar_lea.hbm %s981_s6, 3072  ;;  %s725_s21 = scalar_lea.hbm %s1041_s3, 6144 }
  0xb3   : > { %p722_p6 = scmp.ne.s32.totalorder %s981_s6, %s721_s27  ;;  %p726_p10 = scmp.lt.s32.totalorder %s981_s6, %s1041_s3 }
  0xb4   : > { %p727_p11 = scmp.lt.s32.totalorder %s725_s21, %s721_s27 }
  0xb5   : > { %p723_p7 = pnand %p722_p6, %p849_p4 }
  0xb6   : > { %p728_p12 = por %p727_p11, %p726_p10 }
  0xb7   : > { %p724_p9 = pneg %p723_p7 }
  0xb9   : > { %p729_p13 = pnand %p728_p12, %p724_p9 }
  0xbb   : > { %732 = shalt.err (!%p729_p13)
}
  0xbc   : > { %s787_s28 = smov 256   ;;  %s788_s29 = smov 16  }
  0xbd   : > { %641 = dma.vmem_to_hbm [thread:$0]  (%p849_p4), %s983_s4, 3072, %s981_s6, %s993_s7, %s787_s28, %s787_s28, %s788_s29  }
  0xbe PF: > { %p647_p0 = scmp.ge.s32.totalorder %s783_s17, 2  ;;  %s530_s30 = sand.u32 1, %s763_s12  }
  0xbf   : > { %s531_s15 = scalar_lea.sflag [#allocation3], %s530_s30 }
  0xc0   : > { %p644_p1 = pnand %p647_p0, %p856_p8 }
  0xc2   : > { %p645_p2 = pneg %p644_p1 }
  0xc4   : > { %758 = dma.done.wait (%p645_p2), %s531_s15, 3072  }
  0xc5   : > { %760 = vsyncadd (%p645_p2), %s531_s15, 4294964224  ;;  %s16_s17 = sadd.s32 1, %s783_s17   ;;  %s1044_s12 = smov %s767_s13 }
  0xc6   : > { %p13_p3 = scmp.ge.s32.totalorder %s16_s17, 4   ;;  %s1045_s13 = smov %s771_s14 }
  0xc7   : > { %s1046_s14 = smov %s862_s25  ;;  %s1047_s15 = smov %s779_s16 }
  0xc8   : > { %s1048_s16 = smov %s1050_s20  ;;  %15 = sbr.rel (!%p13_p3) target bundleno = 4 (0x4), region = 73 }
  0xcd   :  { %536 = vsyncpa [#allocation3], 1 }
  0xce   :  { %538 = vsyncpa [#allocation3 + $0x1], 1 }

</bundles_post_ra>
